<compile_context>
chip_gen: v7x
topology: tpu7x:2x2x1
jax: 0.10.0
libtpu: 0.0.40
codegen_flags: <defaults>
</compile_context>

<pallas_src>
import functools

import jax
import jax.numpy as jnp
from jax.experimental import pallas as pl
from jax.experimental.pallas import tpu as pltpu


def _act_fun_kernel(x_ref, o_ref, *, scale, bias):
    # Elementwise hot path: EUP tanh + one FMA-style affine on the VPU.
    x = x_ref[...].astype(jnp.float32)
    o_ref[...] = (jnp.tanh(x) * scale + bias).astype(o_ref.dtype)


_LANE = 128
_PREFERRED_COLS = (2048, 1024, 512, 256, 128)


def act_fun(x, target_min, target_max, *, max_block_bytes=2 * 1024 * 1024):
    """Applies the Act_fun activation elementwise to x (any shape)."""
    orig_shape = x.shape
    orig_dtype = x.dtype

    scale = float(target_max - target_min) / 2.0
    bias = scale + float(target_min)  # fold the "+1" into the affine bias

    n = x.size
    if n == 0:
        return x

    flat = x.reshape(-1)

    # Pick the widest lane-dense column count that divides the element count.
    cols = None
    for c in _PREFERRED_COLS:
        if n % c == 0:
            cols = c
            break
    pad = 0
    if cols is None:
        # Odd total size: pad only a tiny (<128-elem) tail of the flat array.
        cols = _LANE
        pad = (-n) % cols
        flat = jnp.pad(flat, (0, pad))

    rows = (n + pad) // cols
    x2 = flat.reshape(rows, cols)

    # Block sizing: ~max_block_bytes per buffer; in+out double-buffered = 4x.
    itemsize = jnp.dtype(orig_dtype).itemsize
    rows_per_block = max(8, (max_block_bytes // (cols * itemsize)) // 8 * 8)
    tile_rows = min(rows_per_block, rows)  # == rows (full dim) or 8-aligned

    grid = pl.cdiv(rows, tile_rows)  # ragged last block handled by Pallas

    kernel = functools.partial(_act_fun_kernel, scale=scale, bias=bias)

    out = pl.pallas_call(
        kernel,
        out_shape=jax.ShapeDtypeStruct((rows, cols), orig_dtype),
        grid_spec=pltpu.PrefetchScalarGridSpec(
            num_scalar_prefetch=0,
            grid=(grid,),
            in_specs=[pl.BlockSpec((tile_rows, cols), lambda i: (i, 0))],
            out_specs=pl.BlockSpec((tile_rows, cols), lambda i: (i, 0)),
        ),
        compiler_params=pltpu.CompilerParams(
            dimension_semantics=("parallel",),
            vmem_limit_bytes=32 * 1024 * 1024,
        ),
    )(x2)

    out = out.reshape(-1)
    if pad:
        out = out[:n]
    return out.reshape(orig_shape)


if __name__ == "__main__":
    # Deterministic small example: NCHW input like a conv feature map.
    key = jax.random.PRNGKey(0)
    x = jax.random.normal(key, (2, 4, 16, 16), dtype=jnp.float32)

    target_min, target_max = 1.0, 3.0

    out = act_fun(x, target_min, target_max)
    out = jax.block_until_ready(out)

    # Pure-JAX reference check.
    ref = (jnp.tanh(x) + 1.0) * ((target_max - target_min) / 2.0) + target_min
    assert out.shape == x.shape and out.dtype == x.dtype
    assert jnp.allclose(out, ref, atol=1e-5, rtol=1e-5)

    print("KERNEL_OK")
</pallas_src>

<mosaic_0001>
module attributes {stable_mosaic.version = 11 : i64} {
  func.func @_act_fun_kernel(%arg0: i32, %arg1: memref<1x2048xf32, #tpu.memory_space<vmem>>, %arg2: memref<1x2048xf32, #tpu.memory_space<vmem>>) attributes {dimension_semantics = [#tpu.dimension_semantics<parallel>], iteration_bounds = array<i64: 1>, scalar_prefetch = 0 : i64, scratch_operands = 0 : i64, tpu.core_type = #tpu.core_type<tc>, window_params = [{transform_indices = @transform_0, window_bounds = array<i64: 1, 2048>}, {transform_indices = @transform_1, window_bounds = array<i64: 1, 2048>}]} {
    %c0 = arith.constant 0 : index
    %c0_0 = arith.constant 0 : index
    %0 = vector.load %arg1[%c0, %c0_0] : memref<1x2048xf32, #tpu.memory_space<vmem>>, vector<1x2048xf32>
    %1 = math.tanh %0 : vector<1x2048xf32>
    %cst = arith.constant 1.000000e+00 : f32
    %2 = vector.broadcast %cst : f32 to vector<1x2048xf32>
    %3 = arith.mulf %1, %2 : vector<1x2048xf32>
    %cst_1 = arith.constant 2.000000e+00 : f32
    %4 = vector.broadcast %cst_1 : f32 to vector<1x2048xf32>
    %5 = arith.addf %3, %4 : vector<1x2048xf32>
    %c0_2 = arith.constant 0 : index
    %c0_3 = arith.constant 0 : index
    %6 = vector.load %arg2[%c0_2, %c0_3] : memref<1x2048xf32, #tpu.memory_space<vmem>>, vector<1x2048xf32>
    tpu.vector_store %arg2[%c0_2, %c0_3], %5 {strides = array<i32>} : memref<1x2048xf32, #tpu.memory_space<vmem>>, vector<1x2048xf32>,
    return
  }
  func.func @transform_0(%arg0: i32) -> (i32, i32) {
    %c0_i32 = arith.constant 0 : i32
    %c0_i32_0 = arith.constant 0 : i32
    return %arg0, %c0_i32 : i32, i32
  }
  func.func @transform_1(%arg0: i32) -> (i32, i32) {
    %c0_i32 = arith.constant 0 : i32
    %c0_i32_0 = arith.constant 0 : i32
    return %arg0, %c0_i32 : i32, i32
  }
}

</mosaic_0001>

<bundles_post_ra>
// kernel: tpu_custom_call.1
= control target key start
LH: loop header
LB: loop body
LE: loop exit
PB: predicated region body
PF: predicated region fallthrough
CT: control target
= control target key end

     0   :  { %6 = vsyncpa [#allocation3], 0  ;;  %s134_s0 = inlined_call_operand.hbm [shape: f32[1,2048], index: 0, kind: input, shape index: {}]   ;;  %s135_s1 = inlined_call_operand.hbm [shape: f32[1,2048], index: 1, kind: output, shape index: {}]  }
   0x1   :  { %7 = vsyncpa [#allocation4], 0  ;;  %s98_s6 = smov [#allocation2]   ;;  %s50_s10 = scalar_lea.hbm %s134_s0, 256 }
   0x2   :  { %s14_s7 = sshll.u32 %s98_s6, 4  ;;  %p51_p0 = scmp.ne.s32.totalorder %s134_s0, %s50_s10  ;;  %s15_s7 = int_to_ptr.vmem [resolvable:$true] %s14_s7 }
   0x3   :  { %p54_p1 = scmp.lt.u32.totalorder %s50_s10, %s134_s0 }
   0x5   :  { %p56_p2 = pnand %p54_p1, %p51_p0 }
   0x7   :  { %59 = shalt.err (!%p56_p2)
}
   0x8   :  { %s60_s15 = scalar_lea.vmem %s15_s7, 256  ;;  %p65_p4 = scmp.lt.s32.totalorder %s15_s7, %s15_s7 }
   0x9   :  { %p61_p3 = scmp.ne.s32.totalorder %s15_s7, %s60_s15  ;;  %p66_p5 = scmp.lt.s32.totalorder %s60_s15, %s60_s15 }
   0xb   :  { %p67_p6 = por %p66_p5, %p65_p4 }
   0xd   :  { %p68_p7 = pnand %p67_p6, %p61_p3 }
   0xf   :  { %71 = shalt.err (!%p68_p7)
}
  0x10   :  { %17 = dma.hbm_to_vmem [thread:$0]  %s134_s0, 256, %s15_s7, [#allocation3]  }
  0x11   :  { %94 = dma.done.wait [#allocation3], 256  }
  0x12   :  { %95 = vsyncadd [#allocation3], 4294967040  ;;  %v21_v0 = vld [vmem:[#allocation2] sm:$0xff]  ;;  %v22_v1 = vld [vmem:[#allocation2 + $0x8] sm:$0xff]  ;;  %s99_s18 = smov [#allocation5]  }
  0x13   :  { %46 = vtanh.f32 %v21_v0  ;;  %s35_s19 = sshll.u32 %s99_s18, 4  ;;  %s36_s19 = int_to_ptr.vmem [resolvable:$true] %s35_s19 }
  0x14   :  { %48 = vtanh.f32 %v22_v1  ;;  %s72_s20 = scalar_lea.vmem %s36_s19, 256  ;;  %p77_p9 = scmp.lt.s32.totalorder %s36_s19, %s36_s19 }
  0x15   :  { %p73_p8 = scmp.ne.s32.totalorder %s36_s19, %s72_s20  ;;  %p78_p10 = scmp.lt.s32.totalorder %s72_s20, %s72_s20 }
  0x17   :  { %p79_p11 = por %p78_p10, %p77_p9 }
  0x19   :  { %p80_p12 = pnand %p79_p11, %p73_p8 }
  0x1d   :  { %v47_v2 = vpop.eup %46 }
  0x1e   :  { %v49_v3 = vpop.eup %48  ;;  %v25_v4 = vadd.f32 2.0, %v47_v2 }
  0x1f   :  { %v26_v5 = vadd.f32 2.0, %v49_v3 }
  0x20   :  { %27 = vst [vmem:[#allocation5] sm:$0xff] %v25_v4 }
  0x21   :  { %28 = vst [vmem:[#allocation5 + $0x8] sm:$0xff] %v26_v5 }
  0x22   :  { %83 = shalt.err (!%p80_p12)
}
  0x23   :  { %s84_s22 = scalar_lea.hbm %s135_s1, 256 }
  0x24   :  { %p85_p13 = scmp.ne.s32.totalorder %s135_s1, %s84_s22  ;;  %p88_p0 = scmp.lt.u32.totalorder %s84_s22, %s135_s1 }
  0x26   :  { %p90_p1 = pnand %p88_p0, %p85_p13 }
  0x28   :  { %93 = shalt.err (!%p90_p1)
}
  0x29   :  { %38 = dma.vmem_to_hbm [thread:$0]  %s36_s19, 256, %s135_s1, [#allocation4]  }
  0x2a   :  { %96 = dma.done.wait [#allocation4], 256  }
  0x2b   :  { %97 = vsyncadd [#allocation4], 4294967040 }
  0x2c   :  { %42 = vsyncpa [#allocation3], 1 }
  0x2d   :  { %43 = vsyncpa [#allocation4], 1 }

</bundles_post_ra>
